<compile_context>
chip_gen: v5e
topology: v5e:2x2
jax: 0.10.0
libtpu: 0.0.40
codegen_flags: <defaults>
</compile_context>

<pallas_src>
import math
from functools import partial

import jax
import jax.numpy as jnp
from jax.experimental import pallas as pl
from jax.experimental.pallas import tpu as pltpu


def _round_up(x, k):
    return ((x + k - 1) // k) * k


def _vmem_capacity_bytes():
    # Generation-aware VMEM capacity (128 MiB on v5e/v6e, 64 MiB per TC on v7x).
    try:
        return int(pltpu.get_tpu_info().vmem_capacity_bytes)
    except Exception:
        return 64 << 20  # conservative fallback = smallest generation


def _choose_mn_tiles(m, n_pad):
    # Balanced M tiles (<=512 rows, multiple of 8) so awkward M values don't pay
    # ~2x pad overhead.
    n_m_tiles = max(1, pl.cdiv(m, 512))
    tile_m = max(8, _round_up(pl.cdiv(m, n_m_tiles), 8))

    # Lane-dense N tile (multiple of 128) that divides the padded N extent.
    tile_n = 128
    for cand in (512, 256, 128):
        if n_pad % cand == 0:
            tile_n = cand
            break

    # v7x has two TensorCores: ensure >= 2 parallel grid steps when possible.
    grid_m, grid_n = pl.cdiv(m, tile_m), n_pad // tile_n
    while grid_m * grid_n < 2:
        if tile_n >= 256:
            tile_n //= 2
        elif tile_m > 8:
            tile_m = max(8, _round_up(tile_m // 2, 8))
        else:
            break
        grid_m, grid_n = pl.cdiv(m, tile_m), n_pad // tile_n
    return tile_m, tile_n


# ---------------------------------------------------------------------------
# Kernels
# ---------------------------------------------------------------------------

def _rff_resident_kernel(x_ref, w_ref, b_ref, o_ref, *, tile_n):
    """Weight/bias fully resident in VMEM (DMA'd once); grid = (M tiles, N tiles)."""
    j = pl.program_id(1)
    off = pl.multiple_of(j * tile_n, 128)
    w = w_ref[:, pl.ds(off, tile_n)]
    b = b_ref[:, pl.ds(off, tile_n)]
    acc = jnp.dot(x_ref[...], w, preferred_element_type=jnp.float32)
    o_ref[...] = jnp.cos(acc + b).astype(o_ref.dtype)


def _rff_streamed_kernel(x_ref, w_ref, b_ref, o_ref, acc_ref, *, tile_n):
    """Streamed weight tiles with K accumulation; grid = (M, N, K)."""
    k = pl.program_id(2)

    @pl.when(k == 0)
    def _():
        acc_ref[...] = jnp.zeros_like(acc_ref)

    acc_ref[...] += jnp.dot(x_ref[...], w_ref[...],
                            preferred_element_type=jnp.float32)

    @pl.when(k == pl.num_programs(2) - 1)
    def _():
        j = pl.program_id(1)
        off = pl.multiple_of(j * tile_n, 128)
        b = b_ref[:, pl.ds(off, tile_n)]
        o_ref[...] = jnp.cos(acc_ref[...] + b).astype(o_ref.dtype)


# ---------------------------------------------------------------------------
# Wrapper
# ---------------------------------------------------------------------------

@partial(jax.jit, static_argnames=("compute_dtype",))
def custom_random_feature_layer(x, weight, bias, compute_dtype=None):
    """phi = cos(x @ weight + bias) via a Pallas TPU kernel.

    x:      (..., in_features)            float32
    weight: (in_features, out_features)   float32
    bias:   (out_features,)               float32
    compute_dtype: optional (e.g. jnp.bfloat16) dtype for x/W on the MXU;
                   accumulation, bias add and cos stay in float32.
    returns (..., out_features) in x.dtype
    """
    in_features, out_features = weight.shape
    lead_shape = x.shape[:-1]
    m = 1
    for d in lead_shape:
        m *= d
    m = max(m, 1)

    x2d = x.reshape(m, in_features)
    w2d = weight
    b2d = bias.reshape(1, out_features)

    # Keep the output / weight lane-dense: pad N to a multiple of 128.
    n_pad = _round_up(out_features, 128)
    if n_pad != out_features:
        w2d = jnp.pad(w2d, ((0, 0), (0, n_pad - out_features)))
        b2d = jnp.pad(b2d, ((0, 0), (0, n_pad - out_features)))

    if compute_dtype is not None:
        x2d = x2d.astype(compute_dtype)
        w2d = w2d.astype(compute_dtype)
    in_bytes = jnp.dtype(x2d.dtype).itemsize
    out_dtype = x.dtype

    budget = int(_vmem_capacity_bytes() * 3 // 4)
    tile_m, tile_n = _choose_mn_tiles(m, n_pad)

    # Resident-weight regime: whole weight + bias stay in VMEM (constant index
    # map -> DMA'd once), re-used by every M row tile.
    weight_resident_bytes = 2 * in_features * n_pad * in_bytes  # conservative 2x
    resident_cap = min(budget // 2, 16 << 20)

    if weight_resident_bytes <= resident_cap:
        def est(tm):
            return (2 * tm * in_features * in_bytes     # x tile (double buffered)
                    + weight_resident_bytes             # resident weight
                    + 2 * n_pad * 4                     # resident bias
                    + 2 * tm * tile_n * 4)              # output tile

        while est(tile_m) > budget and tile_m > 8:
            tile_m = max(8, _round_up(tile_m // 2, 8))
        grid_m = pl.cdiv(m, tile_m)
        grid_n = n_pad // tile_n
        est_bytes = est(tile_m)

        out = pl.pallas_call(
            partial(_rff_resident_kernel, tile_n=tile_n),
            out_shape=jax.ShapeDtypeStruct((m, n_pad), out_dtype),
            grid_spec=pltpu.PrefetchScalarGridSpec(
                num_scalar_prefetch=0,
                grid=(grid_m, grid_n),
                in_specs=[
                    pl.BlockSpec((tile_m, in_features), lambda i, j: (i, 0)),
                    pl.BlockSpec((in_features, n_pad), lambda i, j: (0, 0)),
                    pl.BlockSpec((1, n_pad), lambda i, j: (0, 0)),
                ],
                out_specs=pl.BlockSpec((tile_m, tile_n), lambda i, j: (i, j)),
            ),
            compiler_params=pltpu.CompilerParams(
                dimension_semantics=("parallel", "parallel"),
                vmem_limit_bytes=min(budget, max(32 << 20, int(est_bytes * 3 // 2))),
            ),
        )(x2d, w2d, b2d)
    else:
        # Streamed-weight regime (large K*N): tile the weight along N (and K when
        # the double-buffered working set would not fit), accumulate in f32 VMEM.
        tile_k = in_features

        def est(tm, tn, tk):
            return (2 * tm * tk * in_bytes              # x tile
                    + 2 * tk * tn * in_bytes            # weight tile
                    + 2 * n_pad * 4                     # resident bias
                    + 2 * tm * tn * 4                   # output tile
                    + tm * tn * 4)                      # accumulator scratch

        while est(tile_m, tile_n, tile_k) > budget and tile_k > 512:
            tile_k = max(512, _round_up(tile_k // 2, 128))
        while est(tile_m, tile_n, tile_k) > budget and tile_m > 8:
            tile_m = max(8, _round_up(tile_m // 2, 8))
        while est(tile_m, tile_n, tile_k) > budget and tile_n > 128:
            tile_n //= 2

        k_pad = _round_up(in_features, tile_k) if tile_k < in_features else in_features
        if k_pad != in_features:
            # Zero-pad K so split accumulation never reads garbage.
            x2d = jnp.pad(x2d, ((0, 0), (0, k_pad - in_features)))
            w2d = jnp.pad(w2d, ((0, k_pad - in_features), (0, 0)))

        grid_m = pl.cdiv(m, tile_m)
        grid_n = n_pad // tile_n
        grid_k = k_pad // tile_k
        est_bytes = est(tile_m, tile_n, tile_k)

        out = pl.pallas_call(
            partial(_rff_streamed_kernel, tile_n=tile_n),
            out_shape=jax.ShapeDtypeStruct((m, n_pad), out_dtype),
            grid_spec=pltpu.PrefetchScalarGridSpec(
                num_scalar_prefetch=0,
                grid=(grid_m, grid_n, grid_k),
                in_specs=[
                    pl.BlockSpec((tile_m, tile_k), lambda i, j, k: (i, k)),
                    pl.BlockSpec((tile_k, tile_n), lambda i, j, k: (k, j)),
                    pl.BlockSpec((1, n_pad), lambda i, j, k: (0, 0)),
                ],
                out_specs=pl.BlockSpec((tile_m, tile_n), lambda i, j, k: (i, j)),
                scratch_shapes=[pltpu.VMEM((tile_m, tile_n), jnp.float32)],
            ),
            compiler_params=pltpu.CompilerParams(
                dimension_semantics=("parallel", "parallel", "arbitrary"),
                vmem_limit_bytes=min(budget, max(32 << 20, int(est_bytes * 3 // 2))),
            ),
        )(x2d, w2d, b2d)

    if n_pad != out_features:
        out = out[:, :out_features]
    return out.reshape(*lead_shape, out_features)


if __name__ == "__main__":
    key = jax.random.PRNGKey(0)
    kx, kw, kb, kx2, kw3, kb3, kx3 = jax.random.split(key, 7)

    batch, seq, in_features, out_features = 2, 8, 32, 128

    # Deterministic parameter init mirroring the PyTorch defaults.
    weight = jax.random.normal(kw, (in_features, out_features), dtype=jnp.float32)
    bias = jax.random.uniform(
        kb, (out_features,), dtype=jnp.float32, minval=0.0, maxval=2.0 * math.pi
    )

    # Case 1: small 3-D input (grid gets split for v7x two-core coverage).
    x = jax.random.normal(kx, (batch, seq, in_features), dtype=jnp.float32)
    phi = jax.block_until_ready(custom_random_feature_layer(x, weight, bias))
    ref = jnp.cos(x @ weight + bias)
    assert phi.shape == (batch, seq, out_features)
    assert jnp.allclose(phi, ref, atol=1e-5, rtol=1e-5)

    # Case 2: flattened batch not divisible by the tile size (balanced M tiles +
    # boundary-block handling, no jnp.pad on x).
    x2 = jax.random.normal(kx2, (520, in_features), dtype=jnp.float32)
    phi2 = jax.block_until_ready(custom_random_feature_layer(x2, weight, bias))
    ref2 = jnp.cos(x2 @ weight + bias)
    assert phi2.shape == (520, out_features)
    assert jnp.allclose(phi2, ref2, atol=1e-5, rtol=1e-5)

    # Case 3: out_features not a multiple of 128 (exercises N padding + the
    # in-kernel pl.ds slice of the resident weight/bias at a non-zero offset).
    out_features3 = 160
    weight3 = jax.random.normal(kw3, (in_features, out_features3), dtype=jnp.float32)
    bias3 = jax.random.uniform(
        kb3, (out_features3,), dtype=jnp.float32, minval=0.0, maxval=2.0 * math.pi
    )
    x3 = jax.random.normal(kx3, (24, in_features), dtype=jnp.float32)
    phi3 = jax.block_until_ready(custom_random_feature_layer(x3, weight3, bias3))
    ref3 = jnp.cos(x3 @ weight3 + bias3)
    assert phi3.shape == (24, out_features3)
    assert jnp.allclose(phi3, ref3, atol=1e-5, rtol=1e-5)

    print("KERNEL_OK")
</pallas_src>

<mosaic_0001>
module attributes {stable_mosaic.version = 11 : i64} {
  func.func @_rff_resident_kernel(%arg0: i32, %arg1: i32, %arg2: memref<8x32xf32, #tpu.memory_space<vmem>>, %arg3: memref<32x128xf32, #tpu.memory_space<vmem>>, %arg4: memref<1x128xf32, #tpu.memory_space<vmem>>, %arg5: memref<8x128xf32, #tpu.memory_space<vmem>>) attributes {dimension_semantics = [#tpu.dimension_semantics<parallel>, #tpu.dimension_semantics<parallel>], iteration_bounds = array<i64: 2, 1>, scalar_prefetch = 0 : i64, scratch_operands = 0 : i64, tpu.core_type = #tpu.core_type<tc>, window_params = [{transform_indices = @transform_0, window_bounds = array<i64: 8, 32>}, {pipeline_mode = #tpu.pipeline_mode<synchronous>, transform_indices = @transform_1, window_bounds = array<i64: 32, 128>}, {pipeline_mode = #tpu.pipeline_mode<synchronous>, transform_indices = @transform_2, window_bounds = array<i64: 1, 128>}, {transform_indices = @transform_3, window_bounds = array<i64: 8, 128>}]} {
    %c128_i32 = arith.constant 128 : i32
    %0 = arith.muli %arg1, %c128_i32 : i32
    %1 = tpu.assume_multiple %0, 128 : i32
    %c0 = arith.constant 0 : index
    %2 = arith.index_cast %1 : i32 to index
    %3 = vector.load %arg3[%c0, %2] : memref<32x128xf32, #tpu.memory_space<vmem>>, vector<32x128xf32>
    %c0_0 = arith.constant 0 : index
    %4 = arith.index_cast %1 : i32 to index
    %5 = vector.load %arg4[%c0_0, %4] : memref<1x128xf32, #tpu.memory_space<vmem>>, vector<1x128xf32>
    %c0_1 = arith.constant 0 : index
    %c0_2 = arith.constant 0 : index
    %6 = vector.load %arg2[%c0_1, %c0_2] : memref<8x32xf32, #tpu.memory_space<vmem>>, vector<8x32xf32>
    %cst = arith.constant dense<0.000000e+00> : vector<8x128xf32>
    %7 = tpu.matmul %6, %3, %cst {dimension_numbers = #tpu.dot_dimension_numbers<[1], [0], [0], [1], [0, 0, 1, 1], [], []>} : vector<8x32xf32>, vector<32x128xf32>, vector<8x128xf32> -> vector<8x128xf32>
    %8 = vector.broadcast %5 : vector<1x128xf32> to vector<8x128xf32>
    %9 = arith.addf %7, %8 : vector<8x128xf32>
    %10 = math.cos %9 : vector<8x128xf32>
    %c0_3 = arith.constant 0 : index
    %c0_4 = arith.constant 0 : index
    %11 = vector.load %arg5[%c0_3, %c0_4] : memref<8x128xf32, #tpu.memory_space<vmem>>, vector<8x128xf32>
    tpu.vector_store %arg5[%c0_3, %c0_4], %10 {strides = array<i32>} : memref<8x128xf32, #tpu.memory_space<vmem>>, vector<8x128xf32>,
    return
  }
  func.func @transform_0(%arg0: i32, %arg1: i32) -> (i32, i32) {
    %c0_i32 = arith.constant 0 : i32
    %c0_i32_0 = arith.constant 0 : i32
    return %arg0, %c0_i32 : i32, i32
  }
  func.func @transform_1(%arg0: i32, %arg1: i32) -> (i32, i32) {
    %c0_i32 = arith.constant 0 : i32
    %c0_i32_0 = arith.constant 0 : i32
    %c0_i32_1 = arith.constant 0 : i32
    return %c0_i32, %c0_i32_0 : i32, i32
  }
  func.func @transform_2(%arg0: i32, %arg1: i32) -> (i32, i32) {
    %c0_i32 = arith.constant 0 : i32
    %c0_i32_0 = arith.constant 0 : i32
    %c0_i32_1 = arith.constant 0 : i32
    return %c0_i32, %c0_i32_0 : i32, i32
  }
  func.func @transform_3(%arg0: i32, %arg1: i32) -> (i32, i32) {
    %c0_i32 = arith.constant 0 : i32
    return %arg0, %arg1 : i32, i32
  }
}

</mosaic_0001>

<bundles_post_ra>
// kernel: custom_random_feature_layer.1
= control target key start
LH: loop header
LB: loop body
LE: loop exit
PB: predicated region body
PF: predicated region fallthrough
CT: control target
= control target key end

     0   :  { %8 = vsyncpa [#allocation3], 0  ;;  %s1014_s0 = inlined_call_operand.hbm [shape: f32[16,32], index: 0, kind: input, shape index: {}]   ;;  %s1015_s1 = inlined_call_operand.hbm [shape: f32[32,128], index: 1, kind: input, shape index: {}]   ;;  %s1016_s2 = inlined_call_operand.vmem [shape: f32[1,128], index: 2, kind: input, shape index: {}]   ;;  %s1017_s3 = inlined_call_operand.hbm [shape: f32[16,128], index: 3, kind: output, shape index: {}]  }
   0x1   :  { %10 = vsyncpa [#allocation3 + $0x1], 0 }
   0x2   :  { %11 = vsyncpa [#allocation6], 0 }
   0x3   :  { %12 = vsyncpa [#allocation4], 0 }
   0x4   :  { %14 = vsyncpa [#allocation4 + $0x1], 0  ;;  %s800_s12 = smov 0   ;;  %s802_s13 = smov 0  }
   0x5   :  { %s804_s14 = smov 0   ;;  %s806_s15 = smov 0  }
   0x6   :  { %s808_s16 = smov 0   ;;  %s810_s17 = smov 0  }
   0x7 LB: > { %s520_s18 = sadd.s32 4294967295, %s768_s17   ;;  %p522_p0 = scmp.ge.s32.totalorder %s768_s17, 1  ;;  %s768_s17 = sphi %s810_s17, %s20_s17   ;;  %s764_s16 = sphi %s808_s16, %s1030_s16   ;;  %s760_s15 = sphi %s806_s15, %s1029_s15   ;;  %s756_s14 = sphi %s804_s14, %s1028_s14   ;;  %s752_s13 = sphi %s802_s13, %s1027_s13   ;;  %s748_s12 = sphi %s800_s12, %s1026_s12  }
   0x8   : > { %p832_p1 = scmp.eq.s32.totalorder %s520_s18, 0  ;;  %p133_p2 = scmp.lt.s32.totalorder %s768_s17, 3 }
   0x9   : > { %s144_s22 = sshll.u32 %s1015_s1, 4  ;;  %s770_s24 = smov [#allocation5]   ;;  %s145_s22 = int_to_ptr.hbm [resolvable:$true] %s144_s22 }
   0xa   : > { %p840_p3 = pnand %p522_p0, %p133_p2  ;;  %s146_s25 = sshll.u32 %s770_s24, 4  ;;  %s147_s25 = int_to_ptr.vmem [resolvable:$true] %s146_s25 }
   0xb   : > { %p524_p6 = scmp.ge.s32.totalorder %s768_s17, 2  ;;  %s771_s26 = smov 128  }
   0xc   : > { %p547_p4 = pneg %p840_p3  ;;  %s772_s27 = smov 8  }
   0xd   : > { %s521_s28 = sadd.s32 4294967294, %s768_s17   ;;  %s32_s29 = sadd.s32 1, %s764_s16 }
   0xe   : > { %p548_p5 = pnand %p547_p4, %p832_p1  ;;  %s39_s30 = sadd.s32 1, %s756_s14 }
   0xf   : > { %p34_p7 = scmp.ge.s32.totalorder %s32_s29, 2  ;;  %p46_p8 = scmp.ne.s32.totalorder %s756_s14, %s752_s13 }
  0x10   : > { %550 = dma.hbm_to_vmem [thread:$0]  (!%p548_p5), %s145_s22, 512, %s147_s25, [#allocation6], %s771_s26, %s771_s26, %s772_s27  }
  0x11   : > { %p47_p9 = scmp.eq.s32.totalorder %s768_s17, 0  ;;  %p52_p10 = scmp.ne.s32.totalorder %s752_s13, %s748_s12 }
  0x12   : > { %s1032_s29 = smov (%p34_p7, %s32_s29), 0  ;;  %p120_p13 = scmp.eq.s32.totalorder %s520_s18, 1 }
  0x13   : > { %p859_p11 = por %p47_p9, %p46_p8  ;;  %p865_p12 = por %p832_p1, %p52_p10 }
  0x14   : > { %s36_s6 = ssub.s32 %s764_s16, %s1032_s29  ;;  %p126_p2 = scmp.eq.s32.totalorder %s521_s28, 1 }
  0x15   : > { %p37_p0 = scmp.eq.s32.totalorder %s36_s6, 0  ;;  %p871_p4 = por %p120_p13, %p46_p8 }
  0x16   : > { %p560_p5 = scmp.lt.s32.totalorder %s768_s17, 2  ;;  %p879_p7 = por %p126_p2, %p52_p10 }
  0x17   : > { %s877_s8 = scalar_select %p37_p0, %s756_s14, %s39_s30  }
  0x18   : > { %s163_s10 = sand.u32 1, %s756_s14   ;;  %s526_s20 = sshll.u32 %s764_s16, 3 }
  0x19   : > { %s525_s11 = sshll.u32 %s163_s10, 3  ;;  %s171_s18 = scalar_lea.hbm %s1014_s0, %s526_s20 }
  0x1a   : > { %s167_s24 = scalar_lea.vmem [#allocation2], %s525_s11  ;;  %s173_s26 = sshll.u32 %s171_s18, 4  ;;  %s174_s26 = int_to_ptr.hbm [resolvable:$true] %s173_s26 }
  0x1b   : > { %s175_s25 = sshll.u32 %s167_s24, 4  ;;  %p552_p8 = pnand %p560_p5, %p859_p11  ;;  %s176_s25 = int_to_ptr.vmem [resolvable:$true] %s175_s25 }
  0x1c   : > { %s164_s27 = scalar_lea.sflag [#allocation3], %s163_s10  ;;  %184 = sbr.rel (%p840_p3) target bundleno = 271 (0x10f), region = 32 }
  0x1d   : > { %554 = dma.hbm_to_vmem [thread:$0]  (!%p552_p8), %s174_s26, 128, %s176_s25, %s164_s27  }
  0x1e   : > { %s893_s28 = sand.u32 (!%p840_p3), 1, %s752_s13  }
  0x1f   : > { %s528_s30 = sshll.u32 (!%p840_p3), %s893_s28, 3  ;;  %s187_s6 = scalar_lea.sflag (!%p840_p3), [#allocation3], %s893_s28 }
  0x20   : > { %s190_s11 = scalar_lea.vmem (!%p840_p3), [#allocation2], %s528_s30 }
  0x21   : > { %735 = dma.done.wait (%p865_p12), %s187_s6, 128  }
  0x22   : > { %737 = vsyncadd (%p865_p12), %s187_s6, 4294967168 }
  0x23   : > { %739 = dma.done.wait (%p832_p1), [#allocation6], 512  }
  0x24   : > { %741 = vsyncadd (%p832_p1), [#allocation6], 4294966784  ;;  %v226_v0 = vld [vmem:[#allocation5 + $0x18] sm:$0xff]  ;;  %v225_v1 = vld [vmem:[#allocation5 + $0x10] sm:$0xff]  ;;  %vm233_vm0 = vcmask 261120   ;;  %s536_s19 = sshll.u32 %s760_s15, 3 }
  0x25   : > { %249 = vmatpush.msra.mxu0 %v226_v0  ;;  %v224_v2 = vld [vmem:[#allocation5 + $0x8] sm:$0xff]  ;;  %v223_v3 = vld [vmem:[#allocation5] sm:$0xff]  ;;  %v229_v4 = vld [vmem:[%s190_s11] sm:$0xff]  ;;  %v773_v19 = vmov 683565275   ;;  %s424_s20 = scalar_lea.hbm %s1017_s3, %s536_s19  ;;  %s218_s21 = scalar_lea.vmem [#allocation7], %s528_s30 }
  0x26   : > { %v621_v5 = vld [vmem:[%s1016_s2] ss:$0 sm:$0xff]  ;;  %v774_v21 = vmov 2475754826   ;;  %v775_v24 = vmov 2131351028  }
  0x27   : > { %250 = vmatpush.msra.mxu0 %v225_v1  ;;  %v776_v27 = vmov 2102212464   ;;  %v777_v30 = vmov 920167782   ;;  %v778_v33 = vmov 1326507024  }
  0x28   : > { %s426_s22 = sshll.u32 %s218_s21, 4  ;;  %s428_s18 = sshll.u32 %s424_s20, 4  ;;  %s427_s22 = int_to_ptr.vmem [resolvable:$true] %s426_s22  ;;  %s429_s18 = int_to_ptr.hbm [resolvable:$true] %s428_s18 }
  0x29   : > { %251 = vmatpush.msra.mxu0 %v224_v2  ;;  %s413_s15 = scalar_lea.sflag [#allocation4], %s893_s28  ;;  %s696_s24 = sshra.s32 %s429_s18, 4  ;;  %s697_s24 = int_to_ptr.hbm [resolvable:$true] %s696_s24 }
  0x2a   : > { %s698_s25 = scalar_lea.hbm %s697_s24, 8  ;;  %s702_s30 = scalar_lea.hbm %s1017_s3, 16 }
  0x2b   : > { %252 = vmatpush.msra.mxu0 %v223_v3  ;;  %v779_v3 = vmov 0   ;;  %p699_p1 = scmp.ne.s32.totalorder %s697_s24, %s698_s25  ;;  %p703_p10 = scmp.lt.s32.totalorder %s697_s24, %s1017_s3 }
  0x2c   : > { %531 = vmatmul.msk.f32.vlgmr.msra.gmra.mxu0 %vm233_vm0, %v229_v4  ;;  %p704_p11 = scmp.lt.s32.totalorder %s702_s30, %s698_s25 }
  0x2d   : > { %p700_p3 = pnand %p699_p1, %p871_p4 }
  0x2e   : > { %p705_p12 = por %p704_p11, %p703_p10 }
  0x2f   : > { %p701_p9 = pneg %p700_p3 }
  0x31   : > { %p706_p13 = pnand %p705_p12, %p701_p9 }
  0xa9   : > { %v254_v6 = vpop.f32.mrf.mxu0 }
  0xaa   : > { %v910_v7 = vadd.f32 %v621_v5, %v254_v6 }
  0xac   : > { %v260_v8 = vand.u32 2139095040, %v910_v7  ;;  %v257_v11 = vand.u32 2147483647, %v910_v7  ;;  %vm259_vm13 = vcmp.lt.s32.totalorder %v910_v7, 0 }
  0xae   : > { %v261_v9 = vshrl.u32 %v260_v8, 23  ;;  %v264_v13 = vand.u32 8388607, %v257_v11  ;;  %vm964_vm14 = vcmp.le.f32.partialorder %v257_v11, 0.7853982 }
  0xb0   : > { %v532_v10 = vadd.s32 4294967169, %v261_v9  ;;  %v265_v17 = vor.u32 8388608, %v264_v13 }
  0xb2   : > { %v267_v12 = vadd.s32 1, %v532_v10  ;;  %v927_v40 = vshll.u32 %v265_v17, 8 }
  0xb4   : > { %vm268_vm1 = vcmp.gt.s32.totalorder %v267_v12, 0  ;;  %v306_v49 = vand.u32 65535, %v927_v40  ;;  %v307_v50 = vshrl.u32 %v927_v40, 16 }
  0xb5   : > { %v269_v14 = vsel %vm268_vm1, %v267_v12, 0 }
  0xb6   : > { %v271_v15 = vand.u32 31, %v269_v14  ;;  %v918_v18 = vshrl.u32 %v269_v14, 5 }
  0xb8   : > { %v916_v16 = vsub.s32 32, %v271_v15  ;;  %v274_v20 = vshll.u32 %v773_v19, %v271_v15  ;;  %v277_v22 = vshll.u32 %v774_v21, %v271_v15  ;;  %v280_v26 = vshll.u32 %v775_v24, %v271_v15 }
  0xb9   : > { %v283_v29 = vshll.u32 %v776_v27, %v271_v15  ;;  %v286_v32 = vshll.u32 %v777_v30, %v271_v15  ;;  %vm289_vm2 = vcmp.lt.s32.totalorder %v918_v18, 1  ;;  %vm292_vm3 = vcmp.lt.s32.totalorder %v918_v18, 4 }
  0xba   : > { %v275_v23 = vshrl.u32 %v774_v21, %v916_v16  ;;  %v278_v25 = vshrl.u32 %v775_v24, %v916_v16  ;;  %v281_v28 = vshrl.u32 %v776_v27, %v916_v16  ;;  %v284_v31 = vshrl.u32 %v777_v30, %v916_v16 }
  0xbb   : > { %v287_v34 = vshrl.u32 %v778_v33, %v916_v16  ;;  %vm291_vm4 = vcmp.lt.s32.totalorder %v918_v18, 3  ;;  %vm290_vm5 = vcmp.lt.s32.totalorder %v918_v18, 2  ;;  %v273_v14 = vshrl.u32 %v773_v19, %v916_v16 }
  0xbc   : > { %v276_v35 = vor.u32 %v275_v23, %v274_v20  ;;  %v279_v36 = vor.u32 %v278_v25, %v277_v22  ;;  %v282_v37 = vor.u32 %v281_v28, %v280_v26  ;;  %v285_v38 = vor.u32 %v284_v31, %v283_v29 }
  0xbd   : > { %v288_v39 = vor.u32 %v287_v34, %v286_v32 }
  0xbe   : > { %v297_v41 = vsel %vm289_vm2, %v276_v35, %v279_v36  ;;  %v301_v42 = vsel %vm289_vm2, %v279_v36, %v282_v37  ;;  %v298_v43 = vsel %vm292_vm3, %v285_v38, 920167782  ;;  %v294_v10 = vsel %vm292_vm3, %v282_v37, 2102212464 }
  0xbf   : > { %v302_v44 = vsel %vm292_vm3, %v288_v39, 1326507024  ;;  %v299_v45 = vsel %vm291_vm4, %v282_v37, %v298_v43  ;;  %v293_v23 = vsel %vm289_vm2, %v273_v14, %v276_v35  ;;  %v295_v24 = vsel %vm291_vm4, %v279_v36, %v294_v10 }
  0xc0   : > { %v303_v46 = vsel %vm291_vm4, %v285_v38, %v302_v44  ;;  %v300_v47 = vsel %vm290_vm5, %v297_v41, %v299_v45  ;;  %v296_v16 = vsel %vm290_vm5, %v293_v23, %v295_v24  ;;  %vm400_vm2 = vweird.f32 %v910_v7 }
  0xc1   : > { %v304_v48 = vsel %vm290_vm5, %v301_v42, %v303_v46  ;;  %v330_v53 = vand.u32 65535, %v300_v47  ;;  %v331_v54 = vshrl.u32 %v300_v47, 16  ;;  %v350_v32 = vmul.u32 %v927_v40, %v296_v16 }
  0xc2   : > { %v308_v51 = vand.u32 65535, %v304_v48  ;;  %v309_v52 = vshrl.u32 %v304_v48, 16 }
  0xc3   : > { %v333_v57 = vmul.u32 %v331_v54, %v306_v49  ;;  %v334_v58 = vmul.u32 %v330_v53, %v307_v50  ;;  %v332_v62 = vmul.u32 %v330_v53, %v306_v49  ;;  %v335_v2 = vmul.u32 %v331_v54, %v307_v50 }
  0xc4   : > { %v311_v55 = vmul.u32 %v309_v52, %v306_v49  ;;  %v312_v56 = vmul.u32 %v308_v51, %v307_v50  ;;  %v310_v59 = vmul.u32 %v308_v51, %v306_v49  ;;  %v313_v61 = vmul.u32 %v309_v52, %v307_v50 }
  0xc5   : > { %v336_v63 = vshll.u32 %v333_v57, 16  ;;  %v338_v5 = vshll.u32 %v334_v58, 16  ;;  %v337_v21 = vshrl.u32 %v333_v57, 16  ;;  %v339_v27 = vshrl.u32 %v334_v58, 16 }
  0xc6   : > { %v314_v60 = vshll.u32 %v311_v55, 16  ;;  %v316_v0 = vshll.u32 %v312_v56, 16  ;;  %v315_v15 = vshrl.u32 %v311_v55, 16  ;;  %v317_v25 = vshrl.u32 %v312_v56, 16 }
  0xc7   : > { %vm340_vm7 = vc.u32 %v332_v62, %v336_v63  ;;  %v342_v6 = vadd.s32 %v336_v63, %v332_v62 }
  0xc8   : > { %vm318_vm6 = vc.u32 %v310_v59, %v314_v60  ;;  %v320_v1 = vadd.s32 %v314_v60, %v310_v59  ;;  %v341_v9 = vsel %vm340_vm7, 1, %v779_v3 }
  0xc9   : > { %v319_v4 = vsel %vm318_vm6, 1, %v779_v3  ;;  %v343_v13 = vadd.s32 %v341_v9, %v335_v2  ;;  %vm344_vm9 = vc.u32 %v342_v6, %v338_v5  ;;  %v346_v30 = vadd.s32 %v342_v6, %v338_v5 }
  0xca   : > { %v321_v8 = vadd.s32 %v319_v4, %v313_v61  ;;  %vm322_vm8 = vc.u32 %v320_v1, %v316_v0  ;;  %v345_v20 = vsel %vm344_vm9, 1, %v779_v3 }
  0xcb   : > { %v323_v12 = vsel %vm322_vm8, 1, %v779_v3  ;;  %v347_v22 = vadd.s32 %v345_v20, %v343_v13 }
  0xcc   : > { %v325_v17 = vadd.s32 %v323_v12, %v321_v8 }
  0xcd   : > { %v348_v28 = vadd.s32 %v347_v22, %v337_v21 }
  0xce   : > { %v326_v26 = vadd.s32 %v325_v17, %v315_v15 }
  0xcf   : > { %v349_v19 = vadd.s32 %v348_v28, %v339_v27 }
  0xd0   : > { %v327_v29 = vadd.s32 %v326_v26, %v317_v25 }
  0xd1   : > { %v353_v31 = vadd.s32 1, %v349_v19 }
  0xd2   : > { %vm352_vm10 = vc.u32 %v327_v29, %v346_v30  ;;  %v351_v18 = vadd.s32 %v346_v30, %v327_v29 }
  0xd3   : > { %v354_v33 = vsel %vm352_vm10, %v353_v31, %v349_v19 }
  0xd4   : > { %v355_v34 = vadd.s32 %v354_v33, %v350_v32 }
  0xd6   : > { %v356_v35 = vadd.s32 536870912, %v355_v34 }
  0xd8   : > { %v357_v37 = vshrl.u32 %v356_v35, 30 }
  0xda   : > { %v358_v38 = vshll.u32 %v357_v37, 30  ;;  %v381_v62 = vsub.s32 4, %v357_v37 }
  0xdc   : > { %v359_v36 = vsub.s32 %v355_v34, %v358_v38  ;;  %v382_v3 = vsel %vm259_vm13, %v381_v62, %v357_v37 }
  0xdd   : > { %v384_v6 = vsel %vm964_vm14, 0, %v382_v3 }
  0xde   : > { %vm360_vm11 = vcmp.lt.s32.totalorder %v359_v36, 0  ;;  %v361_v39 = vsub.s32 0, %v359_v36  ;;  %v401_v12 = vand.u32 3, %v384_v6 }
  0xe0   : > { %v362_v41 = vsel %vm360_vm11, %v361_v39, %v359_v36  ;;  %vm403_vm15 = vcmp.eq.s32.totalorder %v401_v12, 0  ;;  %vm406_vm0 = vcmp.eq.s32.totalorder %v401_v12, 2  ;;  %vm402_vm1 = vcmp.lt.s32.totalorder %v401_v12, 2 }
  0xe1   : > { %v363_v42 = vclz %v362_v41 }
  0xe3   : > { %v533_v43 = vadd.s32 4294967294, %v363_v42 }
  0xe5   : > { %vm534_vm12 = vcmp.lt.s32.totalorder %v533_v43, 0 }
  0xe6   : > { %v366_v44 = vsel %vm534_vm12, 0, %v533_v43 }
  0xe7   : > { %v367_v45 = vsub.s32 32, %v366_v44  ;;  %v371_v46 = vsub.s32 4294967266, %v366_v44  ;;  %v368_v47 = vshll.u32 %v359_v36, %v366_v44 }
  0xe9   : > { %v369_v48 = vshrl.u32 %v351_v18, %v367_v45  ;;  %v372_v49 = vadd.s32 127, %v371_v46 }
  0xeb   : > { %v370_v40 = vor.u32 %v369_v48, %v368_v47  ;;  %v373_v50 = vshll.u32 %v372_v49, 23 }
  0xed   : > { %v374_v51 = vor.u32 4788187, %v373_v50  ;;  %v377_v53 = vcvt.s32.f32 %v370_v40 }
  0xef   : > { %v375_v52 = vand.u32 2147483647, %v374_v51 }
  0xf1   : > { %v378_v54 = vmul.f32 %v377_v53, %v375_v52 }
  0xf3   : > { %v379_v55 = vxor.u32 2147483648, %v378_v54 }
  0xf5   : > { %v380_v57 = vsel %vm259_vm13, %v379_v55, %v378_v54 }
  0xf6   : > { %v383_v58 = vsel %vm964_vm14, %v910_v7, %v380_v57 }
  0xf7   : > { %v385_v59 = vmul.f32 %v383_v58, %v383_v58 }
  0xf9   : > { %v393_v60 = vmul.f32 -0.00019511016, %v385_v59  ;;  %v386_v61 = vmul.f32 -0.001358992, %v385_v59 }
  0xfb   : > { %v394_v63 = vadd.f32 0.008332121, %v393_v60  ;;  %v387_v0 = vadd.f32 0.041655596, %v386_v61 }
  0xfd   : > { %v395_v1 = vmul.f32 %v394_v63, %v385_v59  ;;  %v388_v2 = vmul.f32 %v387_v0, %v385_v59 }
  0xff   : > { %v396_v11 = vadd.f32 -0.16666654, %v395_v1  ;;  %v389_v4 = vadd.f32 -0.4999988, %v388_v2 }
 0x101   : > { %v397_v5 = vmul.f32 %v396_v11, %v385_v59  ;;  %v390_v8 = vmul.f32 %v389_v4, %v385_v59 }
 0x103   : > { %v398_v9 = vadd.f32 1.0, %v397_v5  ;;  %v391_v10 = vadd.f32 1.0, %v390_v8 }
 0x105   : > { %v399_v13 = vmul.f32 %v398_v9, %v383_v58  ;;  %v407_v14 = vxor.u32 2147483648, %v391_v10 }
 0x107   : > { %v404_v15 = vxor.u32 2147483648, %v399_v13  ;;  %v408_v20 = vsel %vm406_vm0, %v407_v14, %v399_v13 }
 0x109   : > { %v405_v17 = vsel %vm403_vm15, %v391_v10, %v404_v15 }
 0x10a   : > { %v409_v21 = vsel %vm402_vm1, %v405_v17, %v408_v20 }
 0x10b   : > { %v410_v22 = vsel %vm400_vm2, nan, %v409_v21 }
 0x10c   : > { %411 = vst [vmem:[%s218_s21] sm:$0xff] %v410_v22 }
 0x10d   : > { %709 = shalt.err (!%p706_p13)
}
 0x10e   : > { %545 = dma.vmem_to_hbm [thread:$0]  (%p871_p4), %s427_s22, 128, %s429_s18, %s413_s15  }
 0x10f PF: > { %s440_s28 = sand.u32 1, %s748_s12   ;;  %p556_p0 = pnand %p524_p6, %p879_p7 }
 0x110   : > { %s441_s23 = scalar_lea.sflag [#allocation4], %s440_s28 }
 0x111   : > { %p557_p2 = pneg %p556_p0 }
 0x113   : > { %743 = dma.done.wait (%p557_p2), %s441_s23, 128  }
 0x114   : > { %745 = vsyncadd (%p557_p2), %s441_s23, 4294967168  ;;  %s20_s17 = sadd.s32 1, %s768_s17   ;;  %s1026_s12 = smov %s752_s13 }
 0x115   : > { %p17_p5 = scmp.ge.s32.totalorder %s20_s17, 4   ;;  %s1027_s13 = smov %s756_s14 }
 0x116   : > { %s1028_s14 = smov %s877_s8  ;;  %s1029_s15 = smov %s764_s16 }
 0x117   : > { %s1030_s16 = smov %s1032_s29  ;;  %19 = sbr.rel (!%p17_p5) target bundleno = 7 (0x7), region = 83 }
 0x11c   :  { %447 = vsyncpa [#allocation3], 1 }
 0x11d   :  { %449 = vsyncpa [#allocation3 + $0x1], 1 }
 0x11e   :  { %450 = vsyncpa [#allocation6], 1 }
 0x11f   :  { %451 = vsyncpa [#allocation4], 1 }
 0x120   :  { %453 = vsyncpa [#allocation4 + $0x1], 1 }

</bundles_post_ra>
